<compile_context>
chip_gen: v7x
topology: tpu7x:2x2x1
jax: 0.10.0
libtpu: 0.0.40
codegen_flags: <defaults>
</compile_context>

<pallas_src>
import jax
import jax.numpy as jnp
from jax import lax
from jax.experimental import pallas as pl
from jax.experimental.pallas import tpu as pltpu

NEURAL_NUMS = 50          # H  (real hidden width)
HP = 64                   # H padded (per-branch block width)
H2P = 2 * HP              # 128 = fused / layer width (one full lane tile)
BN_EPS = 1e-5
NEG = -1e30               # "identity" floor for the half-masked ReLU


# ----------------------------------------------------------------------------
# Kernel
# ----------------------------------------------------------------------------
def _bn_cols(z, gamma, beta, mask, inv_n):
    """Training-mode BatchNorm1d on the columns selected by `mask`.

    mask == 1 -> normalize with batch stats (biased variance), affine gamma/beta
    mask == 0 -> identity (column passes through untouched)
    One-pass sum & sum-of-squares statistics; variance clamped at 0 so f32
    cancellation can never feed a negative value into rsqrt.
    """
    s = jnp.sum(z, axis=0, keepdims=True)
    sq = jnp.sum(z * z, axis=0, keepdims=True)
    mean = s * inv_n
    var = jnp.maximum(sq * inv_n - mean * mean, 0.0)
    g_inv = gamma * lax.rsqrt(var + BN_EPS)
    scale = mask * g_inv + (1.0 - mask)
    shift = mask * (beta - mean * g_inv)
    return z * scale + shift


def critic_kernel(z_ref, w_ref, p_ref, q_ref):
    B, FAP = z_ref.shape
    inv_n = 1.0 / B

    z = z_ref[...]                         # (B, FAP) = [x | action | 0-pad]
    p = p_ref[...]                         # (11, W) packed parameter slab

    g_in, be_in, m_in = p[0:1, :FAP], p[1:2, :FAP], p[2:3, :FAP]
    b1      = p[3:4, :H2P]                 # [b_s | 0 | b_a | 0]
    g_l     = p[4:5, :H2P]                 # bn_layer gamma  (cols 0:50)
    be_l    = p[5:6, :H2P]                 # bn_layer beta   (cols 0:50)
    m_h     = p[6:7, :H2P]                 # 1 on cols 0:50, 0 elsewhere
    relu_lo = p[7:8, :H2P]                 # 0 on fc_s block, -1e30 on fc_a block
    b_q     = p[8:9, :H2P]
    w_o     = p[9:10, :H2P]                # fc_ weight as a row vector
    b_o     = p[10:11, 0:1]

    w1 = w_ref[0:FAP, :]                   # block-diag [w_s | w_a], (FAP, 128)
    wq = w_ref[FAP:FAP + H2P, :]           # fc_q embedded, (128, 128)

    # batch_norm_input on the feature columns only (action / pad pass through).
    zin = _bn_cols(z, g_in, be_in, m_in, inv_n)

    # Fused fc_s + fc_a: one MXU pass.
    #   cols [0:50]    fc_s(bn_input(x))  (pre-activation)
    #   cols [64:114]  fc_a(action)
    #   padded cols stay 0 (zero weight columns / zero bias).
    fused = jnp.dot(zin, w1, preferred_element_type=jnp.float32) + b1

    # ReLU on the fc_s half only: single max against [0 | -1e30] row.
    fused = jnp.maximum(fused, relu_lo)

    # bn_layer on the fc_s half only -> result IS cat([bn(xs), fc_a(a)], dim=1).
    xcat = _bn_cols(fused, g_l, be_l, m_h, inv_n)

    # fc_q: one more MXU pass with the zero-padded (128, 128) weight.
    h = jnp.dot(xcat, wq, preferred_element_type=jnp.float32) + b_q

    # q = relu(bn_layer(fc_q(x)))   (padded cols stay 0 through the identity BN)
    hq = jnp.maximum(_bn_cols(h, g_l, be_l, m_h, inv_n), 0.0)

    # Final 50 -> 1 head on the VPU/XLU (multiply + lane reduce), not the MXU.
    # TODO(synk): at large tiled B, return hq (lane-dense) or a (B/128, 128)
    # q layout instead of this (B, 1) masked store.
    q_ref[...] = jnp.sum(hq * w_o, axis=1, keepdims=True) + b_o


# ----------------------------------------------------------------------------
# Operand packing (plain XLA; in a training loop this runs once per parameter
# update, not per forward call)
# ----------------------------------------------------------------------------
def _pack_params(params, F, FAP):
    H = NEURAL_NUMS
    W = max(H2P, FAP)

    def row(*pieces):
        v = jnp.concatenate(
            [jnp.asarray(x, jnp.float32).reshape(1, -1) for x in pieces], axis=1)
        return jnp.pad(v, ((0, 0), (0, W - v.shape[1])))

    rows = [
        row(params["g_in"]),                                          # 0
        row(params["beta_in"]),                                       # 1
        row(jnp.ones((1, F), jnp.float32)),                           # 2 mask_in
        row(params["b_s"], jnp.zeros((1, HP - H)), params["b_a"]),    # 3 b1
        row(params["g_l"]),                                           # 4
        row(params["beta_l"]),                                        # 5
        row(jnp.ones((1, H), jnp.float32)),                           # 6 mask_h
        row(jnp.zeros((1, HP)), jnp.full((1, H2P - HP), NEG)),        # 7 relu_lo
        row(params["b_q"]),                                           # 8
        row(jnp.asarray(params["w_o"]).reshape(1, -1)),               # 9
        row(params["b_o"]),                                           # 10
    ]
    return jnp.concatenate(rows, axis=0)                              # (11, W)


def _pack_weights(params, F, A, FAP):
    """Single weight slab: rows [0:FAP] = block-diag w1, rows [FAP:FAP+128] = wq."""
    H = NEURAL_NUMS
    w1 = jnp.zeros((FAP, H2P), jnp.float32)
    w1 = w1.at[:F, :H].set(jnp.asarray(params["w_s"], jnp.float32))
    w1 = w1.at[F:F + A, HP:HP + H].set(jnp.asarray(params["w_a"], jnp.float32))

    w_q = jnp.asarray(params["w_q"], jnp.float32)
    wq = jnp.zeros((H2P, H2P), jnp.float32)
    wq = wq.at[:H, :H].set(w_q[:H, :])            # bn_layer(xs) rows
    wq = wq.at[HP:HP + H, :H].set(w_q[H:, :])     # fc_a(action) rows
    return jnp.concatenate([w1, wq], axis=0)      # (FAP + 128, 128)


def critic_forward(x, action, params):
    B, F = x.shape
    A = action.shape[1]
    assert B >= 2, "training-mode BatchNorm1d requires batch >= 2"

    FA = F + A
    FAP = ((FA + 7) // 8) * 8       # sublane-align the weight-slab split / K

    z = jnp.zeros((B, FAP), jnp.float32)
    z = z.at[:, :F].set(x.astype(jnp.float32))
    z = z.at[:, F:FA].set(action.astype(jnp.float32))

    wslab = _pack_weights(params, F, A, FAP)
    pslab = _pack_params(params, F, FAP)

    H = NEURAL_NUMS
    flops = int(2 * B * (FA * 2 * H + 2 * H * H) + 12 * B * (FA + 2 * H2P))
    bytes_accessed = int(4 * (z.size + wslab.size + pslab.size + B))
    # Whole-batch footprint: inputs + ~6 (B, 128) f32 intermediates, with slack.
    est = 4 * (z.size + wslab.size + pslab.size + 6 * B * H2P + B)
    vmem_bytes = int(min(100 * 2**20, max(2 * 2**20, 2 * est)))

    vmem = pl.BlockSpec(memory_space=pltpu.MemorySpace.VMEM)
    return pl.pallas_call(
        critic_kernel,
        out_shape=jax.ShapeDtypeStruct((B, 1), jnp.float32),
        in_specs=[vmem, vmem, vmem],
        out_specs=vmem,
        compiler_params=pltpu.CompilerParams(vmem_limit_bytes=vmem_bytes),
        cost_estimate=pl.CostEstimate(
            flops=flops, transcendentals=0, bytes_accessed=bytes_accessed),
    )(z, wslab, pslab)


# ----------------------------------------------------------------------------
# Pure-JAX reference (mirrors the PyTorch module directly)
# ----------------------------------------------------------------------------
def _bn_ref(x, gamma, beta):
    mean = jnp.mean(x, axis=0, keepdims=True)
    var = jnp.mean((x - mean) ** 2, axis=0, keepdims=True)
    return (x - mean) * lax.rsqrt(var + BN_EPS) * gamma + beta


def critic_forward_ref(x, action, p):
    xn = _bn_ref(x, p["g_in"], p["beta_in"])
    xs = jnp.maximum(xn @ p["w_s"] + p["b_s"], 0.0)
    xs_bn = _bn_ref(xs, p["g_l"], p["beta_l"])
    xa = action @ p["w_a"] + p["b_a"]
    xc = jnp.concatenate([xs_bn, xa], axis=1)
    h = xc @ p["w_q"] + p["b_q"]
    hq = jnp.maximum(_bn_ref(h, p["g_l"], p["beta_l"]), 0.0)
    return hq @ p["w_o"] + p["b_o"]


def init_params(key, feature_numbers, action_numbers):
    """Deterministic init mimicking PyTorch Linear default (uniform +/- 1/sqrt(fan_in))."""
    ks = jax.random.split(key, 8)

    def lin(kw, kb, fan_in, fan_out):
        bound = 1.0 / jnp.sqrt(fan_in)
        w = jax.random.uniform(kw, (fan_in, fan_out), jnp.float32, -bound, bound)
        b = jax.random.uniform(kb, (1, fan_out), jnp.float32, -bound, bound)
        return w, b

    w_s, b_s = lin(ks[0], ks[1], feature_numbers, NEURAL_NUMS)
    w_a, b_a = lin(ks[2], ks[3], action_numbers, NEURAL_NUMS)
    w_q, b_q = lin(ks[4], ks[5], 2 * NEURAL_NUMS, NEURAL_NUMS)
    w_o, b_o = lin(ks[6], ks[7], NEURAL_NUMS, 1)

    return {
        "w_s": w_s, "b_s": b_s,
        "w_a": w_a, "b_a": b_a,
        "w_q": w_q, "b_q": b_q,
        "w_o": w_o, "b_o": b_o,
        # BatchNorm affine params at their PyTorch init values.
        "g_in": jnp.ones((1, feature_numbers), jnp.float32),
        "beta_in": jnp.zeros((1, feature_numbers), jnp.float32),
        "g_l": jnp.ones((1, NEURAL_NUMS), jnp.float32),
        "beta_l": jnp.zeros((1, NEURAL_NUMS), jnp.float32),
    }


if __name__ == "__main__":
    B = 8
    feature_numbers = 16
    action_numbers = 4

    key = jax.random.PRNGKey(0)
    k_x, k_a, k_p = jax.random.split(key, 3)
    x = jax.random.normal(k_x, (B, feature_numbers), jnp.float32)
    action = jax.random.normal(k_a, (B, action_numbers), jnp.float32)
    params = init_params(k_p, feature_numbers, action_numbers)

    q = critic_forward(x, action, params)
    q = jax.block_until_ready(q)

    q_ref = critic_forward_ref(x, action, params)
    assert q.shape == (B, 1)
    assert jnp.allclose(q, q_ref, atol=1e-4, rtol=1e-4)

    print("KERNEL_OK")
</pallas_src>

<mosaic_0001>
module attributes {stable_mosaic.version = 11 : i64} {
  func.func @critic_kernel(%arg0: memref<8x24xf32, #tpu.memory_space<vmem>>, %arg1: memref<152x128xf32, #tpu.memory_space<vmem>>, %arg2: memref<11x128xf32, #tpu.memory_space<vmem>>, %arg3: memref<8x1xf32, #tpu.memory_space<vmem>>) attributes {dimension_semantics = [], scalar_prefetch = 0 : i64, scratch_operands = 0 : i64, tpu.core_type = #tpu.core_type<tc>} {
    %c0 = arith.constant 0 : index
    %c0_0 = arith.constant 0 : index
    %0 = vector.load %arg0[%c0, %c0_0] : memref<8x24xf32, #tpu.memory_space<vmem>>, vector<8x24xf32>
    %c0_1 = arith.constant 0 : index
    %c0_2 = arith.constant 0 : index
    %1 = vector.load %arg2[%c0_1, %c0_2] : memref<11x128xf32, #tpu.memory_space<vmem>>, vector<11x128xf32>
    %2 = vector.extract_strided_slice %1 {offsets = [0, 0], sizes = [1, 24], strides = [1, 1]} : vector<11x128xf32> to vector<1x24xf32>
    %3 = vector.extract_strided_slice %1 {offsets = [1, 0], sizes = [1, 24], strides = [1, 1]} : vector<11x128xf32> to vector<1x24xf32>
    %4 = vector.extract_strided_slice %1 {offsets = [2, 0], sizes = [1, 24], strides = [1, 1]} : vector<11x128xf32> to vector<1x24xf32>
    %5 = vector.extract_strided_slice %1 {offsets = [3, 0], sizes = [1, 128], strides = [1, 1]} : vector<11x128xf32> to vector<1x128xf32>
    %6 = vector.extract_strided_slice %1 {offsets = [4, 0], sizes = [1, 128], strides = [1, 1]} : vector<11x128xf32> to vector<1x128xf32>
    %7 = vector.extract_strided_slice %1 {offsets = [5, 0], sizes = [1, 128], strides = [1, 1]} : vector<11x128xf32> to vector<1x128xf32>
    %8 = vector.extract_strided_slice %1 {offsets = [6, 0], sizes = [1, 128], strides = [1, 1]} : vector<11x128xf32> to vector<1x128xf32>
    %9 = vector.extract_strided_slice %1 {offsets = [7, 0], sizes = [1, 128], strides = [1, 1]} : vector<11x128xf32> to vector<1x128xf32>
    %10 = vector.extract_strided_slice %1 {offsets = [8, 0], sizes = [1, 128], strides = [1, 1]} : vector<11x128xf32> to vector<1x128xf32>
    %11 = vector.extract_strided_slice %1 {offsets = [9, 0], sizes = [1, 128], strides = [1, 1]} : vector<11x128xf32> to vector<1x128xf32>
    %12 = vector.extract_strided_slice %1 {offsets = [10, 0], sizes = [1, 1], strides = [1, 1]} : vector<11x128xf32> to vector<1x1xf32>
    %c0_3 = arith.constant 0 : index
    %c0_4 = arith.constant 0 : index
    %13 = vector.load %arg1[%c0_3, %c0_4] : memref<152x128xf32, #tpu.memory_space<vmem>>, vector<24x128xf32>
    %c24 = arith.constant 24 : index
    %c0_5 = arith.constant 0 : index
    %14 = vector.load %arg1[%c24, %c0_5] : memref<152x128xf32, #tpu.memory_space<vmem>>, vector<128x128xf32>
    %cst = arith.constant dense<0.000000e+00> : vector<24xf32>
    %15 = vector.multi_reduction <add>, %0, %cst [0] : vector<8x24xf32> to vector<24xf32>
    %16 = vector.shape_cast %15 : vector<24xf32> to vector<1x24xf32>
    %17 = arith.mulf %0, %0 : vector<8x24xf32>
    %cst_6 = arith.constant dense<0.000000e+00> : vector<24xf32>
    %18 = vector.multi_reduction <add>, %17, %cst_6 [0] : vector<8x24xf32> to vector<24xf32>
    %19 = vector.shape_cast %18 : vector<24xf32> to vector<1x24xf32>
    %cst_7 = arith.constant 1.250000e-01 : f32
    %20 = vector.broadcast %cst_7 : f32 to vector<1x24xf32>
    %21 = arith.mulf %16, %20 : vector<1x24xf32>
    %cst_8 = arith.constant 1.250000e-01 : f32
    %22 = vector.broadcast %cst_8 : f32 to vector<1x24xf32>
    %23 = arith.mulf %19, %22 : vector<1x24xf32>
    %24 = arith.mulf %21, %21 : vector<1x24xf32>
    %25 = arith.subf %23, %24 : vector<1x24xf32>
    %cst_9 = arith.constant 0.000000e+00 : f32
    %26 = vector.broadcast %cst_9 : f32 to vector<1x24xf32>
    %27 = arith.maximumf %25, %26 : vector<1x24xf32>
    %cst_10 = arith.constant 9.99999974E-6 : f32
    %28 = vector.broadcast %cst_10 : f32 to vector<1x24xf32>
    %29 = arith.addf %27, %28 : vector<1x24xf32>
    %30 = math.rsqrt %29 : vector<1x24xf32>
    %31 = arith.mulf %2, %30 : vector<1x24xf32>
    %32 = arith.mulf %4, %31 : vector<1x24xf32>
    %cst_11 = arith.constant 1.000000e+00 : f32
    %33 = vector.broadcast %cst_11 : f32 to vector<1x24xf32>
    %34 = arith.subf %33, %4 : vector<1x24xf32>
    %35 = arith.addf %32, %34 : vector<1x24xf32>
    %36 = arith.mulf %21, %31 : vector<1x24xf32>
    %37 = arith.subf %3, %36 : vector<1x24xf32>
    %38 = arith.mulf %4, %37 : vector<1x24xf32>
    %39 = vector.broadcast %35 : vector<1x24xf32> to vector<8x24xf32>
    %40 = arith.mulf %0, %39 : vector<8x24xf32>
    %41 = vector.broadcast %38 : vector<1x24xf32> to vector<8x24xf32>
    %42 = arith.addf %40, %41 : vector<8x24xf32>
    %cst_12 = arith.constant dense<0.000000e+00> : vector<8x128xf32>
    %43 = tpu.matmul %42, %13, %cst_12 {dimension_numbers = #tpu.dot_dimension_numbers<[1], [0], [0], [1], [0, 0, 1, 1], [], []>} : vector<8x24xf32>, vector<24x128xf32>, vector<8x128xf32> -> vector<8x128xf32>
    %44 = vector.broadcast %5 : vector<1x128xf32> to vector<8x128xf32>
    %45 = arith.addf %43, %44 : vector<8x128xf32>
    %46 = vector.broadcast %9 : vector<1x128xf32> to vector<8x128xf32>
    %47 = arith.maximumf %45, %46 : vector<8x128xf32>
    %cst_13 = arith.constant dense<0.000000e+00> : vector<128xf32>
    %48 = vector.multi_reduction <add>, %47, %cst_13 [0] : vector<8x128xf32> to vector<128xf32>
    %49 = vector.shape_cast %48 : vector<128xf32> to vector<1x128xf32>
    %50 = arith.mulf %47, %47 : vector<8x128xf32>
    %cst_14 = arith.constant dense<0.000000e+00> : vector<128xf32>
    %51 = vector.multi_reduction <add>, %50, %cst_14 [0] : vector<8x128xf32> to vector<128xf32>
    %52 = vector.shape_cast %51 : vector<128xf32> to vector<1x128xf32>
    %cst_15 = arith.constant 1.250000e-01 : f32
    %53 = vector.broadcast %cst_15 : f32 to vector<1x128xf32>
    %54 = arith.mulf %49, %53 : vector<1x128xf32>
    %cst_16 = arith.constant 1.250000e-01 : f32
    %55 = vector.broadcast %cst_16 : f32 to vector<1x128xf32>
    %56 = arith.mulf %52, %55 : vector<1x128xf32>
    %57 = arith.mulf %54, %54 : vector<1x128xf32>
    %58 = arith.subf %56, %57 : vector<1x128xf32>
    %cst_17 = arith.constant 0.000000e+00 : f32
    %59 = vector.broadcast %cst_17 : f32 to vector<1x128xf32>
    %60 = arith.maximumf %58, %59 : vector<1x128xf32>
    %cst_18 = arith.constant 9.99999974E-6 : f32
    %61 = vector.broadcast %cst_18 : f32 to vector<1x128xf32>
    %62 = arith.addf %60, %61 : vector<1x128xf32>
    %63 = math.rsqrt %62 : vector<1x128xf32>
    %64 = arith.mulf %6, %63 : vector<1x128xf32>
    %65 = arith.mulf %8, %64 : vector<1x128xf32>
    %cst_19 = arith.constant 1.000000e+00 : f32
    %66 = vector.broadcast %cst_19 : f32 to vector<1x128xf32>
    %67 = arith.subf %66, %8 : vector<1x128xf32>
    %68 = arith.addf %65, %67 : vector<1x128xf32>
    %69 = arith.mulf %54, %64 : vector<1x128xf32>
    %70 = arith.subf %7, %69 : vector<1x128xf32>
    %71 = arith.mulf %8, %70 : vector<1x128xf32>
    %72 = vector.broadcast %68 : vector<1x128xf32> to vector<8x128xf32>
    %73 = arith.mulf %47, %72 : vector<8x128xf32>
    %74 = vector.broadcast %71 : vector<1x128xf32> to vector<8x128xf32>
    %75 = arith.addf %73, %74 : vector<8x128xf32>
    %cst_20 = arith.constant dense<0.000000e+00> : vector<8x128xf32>
    %76 = tpu.matmul %75, %14, %cst_20 {dimension_numbers = #tpu.dot_dimension_numbers<[1], [0], [0], [1], [0, 0, 1, 1], [], []>} : vector<8x128xf32>, vector<128x128xf32>, vector<8x128xf32> -> vector<8x128xf32>
    %77 = vector.broadcast %10 : vector<1x128xf32> to vector<8x128xf32>
    %78 = arith.addf %76, %77 : vector<8x128xf32>
    %cst_21 = arith.constant dense<0.000000e+00> : vector<128xf32>
    %79 = vector.multi_reduction <add>, %78, %cst_21 [0] : vector<8x128xf32> to vector<128xf32>
    %80 = vector.shape_cast %79 : vector<128xf32> to vector<1x128xf32>
    %81 = arith.mulf %78, %78 : vector<8x128xf32>
    %cst_22 = arith.constant dense<0.000000e+00> : vector<128xf32>
    %82 = vector.multi_reduction <add>, %81, %cst_22 [0] : vector<8x128xf32> to vector<128xf32>
    %83 = vector.shape_cast %82 : vector<128xf32> to vector<1x128xf32>
    %cst_23 = arith.constant 1.250000e-01 : f32
    %84 = vector.broadcast %cst_23 : f32 to vector<1x128xf32>
    %85 = arith.mulf %80, %84 : vector<1x128xf32>
    %cst_24 = arith.constant 1.250000e-01 : f32
    %86 = vector.broadcast %cst_24 : f32 to vector<1x128xf32>
    %87 = arith.mulf %83, %86 : vector<1x128xf32>
    %88 = arith.mulf %85, %85 : vector<1x128xf32>
    %89 = arith.subf %87, %88 : vector<1x128xf32>
    %cst_25 = arith.constant 0.000000e+00 : f32
    %90 = vector.broadcast %cst_25 : f32 to vector<1x128xf32>
    %91 = arith.maximumf %89, %90 : vector<1x128xf32>
    %cst_26 = arith.constant 9.99999974E-6 : f32
    %92 = vector.broadcast %cst_26 : f32 to vector<1x128xf32>
    %93 = arith.addf %91, %92 : vector<1x128xf32>
    %94 = math.rsqrt %93 : vector<1x128xf32>
    %95 = arith.mulf %6, %94 : vector<1x128xf32>
    %96 = arith.mulf %8, %95 : vector<1x128xf32>
    %cst_27 = arith.constant 1.000000e+00 : f32
    %97 = vector.broadcast %cst_27 : f32 to vector<1x128xf32>
    %98 = arith.subf %97, %8 : vector<1x128xf32>
    %99 = arith.addf %96, %98 : vector<1x128xf32>
    %100 = arith.mulf %85, %95 : vector<1x128xf32>
    %101 = arith.subf %7, %100 : vector<1x128xf32>
    %102 = arith.mulf %8, %101 : vector<1x128xf32>
    %103 = vector.broadcast %99 : vector<1x128xf32> to vector<8x128xf32>
    %104 = arith.mulf %78, %103 : vector<8x128xf32>
    %105 = vector.broadcast %102 : vector<1x128xf32> to vector<8x128xf32>
    %106 = arith.addf %104, %105 : vector<8x128xf32>
    %cst_28 = arith.constant 0.000000e+00 : f32
    %107 = vector.broadcast %cst_28 : f32 to vector<8x128xf32>
    %108 = arith.maximumf %106, %107 : vector<8x128xf32>
    %109 = vector.broadcast %11 : vector<1x128xf32> to vector<8x128xf32>
    %110 = arith.mulf %108, %109 : vector<8x128xf32>
    %cst_29 = arith.constant dense<0.000000e+00> : vector<8xf32>
    %111 = vector.multi_reduction <add>, %110, %cst_29 [1] : vector<8x128xf32> to vector<8xf32>
    %112 = vector.shape_cast %111 : vector<8xf32> to vector<8x1xf32>
    %113 = vector.broadcast %12 : vector<1x1xf32> to vector<8x1xf32>
    %114 = arith.addf %112, %113 : vector<8x1xf32>
    %c0_30 = arith.constant 0 : index
    %c0_31 = arith.constant 0 : index
    %115 = vector.load %arg3[%c0_30, %c0_31] : memref<8x1xf32, #tpu.memory_space<vmem>>, vector<8x1xf32>
    tpu.vector_store %arg3[%c0_30, %c0_31], %114 {strides = array<i32>} : memref<8x1xf32, #tpu.memory_space<vmem>>, vector<8x1xf32>,
    return
  }
}

</mosaic_0001>

<bundles_post_ra>
// kernel: tpu_custom_call.1
= control target key start
LH: loop header
LB: loop body
LE: loop exit
PB: predicated region body
PF: predicated region fallthrough
CT: control target
= control target key end

     0   :  { %8 = vsyncpa [#allocation3], 0  ;;  %s688_s0 = inlined_call_operand.hbm [shape: f32[8,24], index: 0, kind: input, shape index: {}]   ;;  %s689_s1 = inlined_call_operand.hbm [shape: f32[152,128], index: 1, kind: input, shape index: {}]   ;;  %s690_s2 = inlined_call_operand.hbm [shape: f32[11,128], index: 2, kind: input, shape index: {}]   ;;  %s691_s3 = inlined_call_operand.vmem [shape: f32[8,1], index: 3, kind: output, shape index: {}]  }
   0x1   :  { %9 = vsyncpa [#allocation5], 0  ;;  %s568_s12 = smov [#allocation4]   ;;  %s498_s16 = scalar_lea.hbm %s689_s1, 2432 }
   0x2   :  { %s25_s13 = sshll.u32 %s568_s12, 4  ;;  %p499_p0 = scmp.ne.s32.totalorder %s689_s1, %s498_s16  ;;  %s26_s13 = int_to_ptr.vmem [resolvable:$true] %s25_s13 }
   0x3   :  { %p502_p1 = scmp.lt.u32.totalorder %s498_s16, %s689_s1 }
   0x5   :  { %p504_p2 = pnand %p502_p1, %p499_p0 }
   0x7   :  { %507 = shalt.err (!%p504_p2)
}
   0x8   :  { %s508_s21 = scalar_lea.vmem %s26_s13, 2432  ;;  %p513_p4 = scmp.lt.s32.totalorder %s26_s13, %s26_s13 }
   0x9   :  { %p509_p3 = scmp.ne.s32.totalorder %s26_s13, %s508_s21  ;;  %p514_p5 = scmp.lt.s32.totalorder %s508_s21, %s508_s21 }
   0xb   :  { %p515_p6 = por %p514_p5, %p513_p4 }
   0xd   :  { %p516_p7 = pnand %p515_p6, %p509_p3 }
   0xf   :  { %519 = shalt.err (!%p516_p7)
}
  0x10   :  { %s569_s22 = smov 128   ;;  %s570_s23 = smov 8  }
  0x11   :  { %31 = dma.hbm_to_vmem [thread:$0]  %s689_s1, 2432, %s26_s13, [#allocation5], %s569_s22, %s569_s22, %s570_s23  }
  0x12   :  { %s571_s26 = smov [#allocation2]   ;;  %s572_s28 = smov [#allocation6]  }
  0x13   :  { %s16_s27 = sshll.u32 %s571_s26, 4  ;;  %s37_s29 = sshll.u32 %s572_s28, 4  ;;  %s17_s27 = int_to_ptr.vmem [resolvable:$true] %s16_s27  ;;  %s38_s29 = int_to_ptr.vmem [resolvable:$true] %s37_s29 }
  0x14   :  { %s520_s5 = scalar_lea.hbm %s688_s0, 128 }
  0x15   :  { %p521_p8 = scmp.ne.s32.totalorder %s688_s0, %s520_s5  ;;  %p524_p9 = scmp.lt.u32.totalorder %s520_s5, %s688_s0 }
  0x17   :  { %p526_p10 = pnand %p524_p9, %p521_p8 }
  0x19   :  { %529 = shalt.err (!%p526_p10)
}
  0x1a   :  { %s530_s1 = scalar_lea.vmem %s17_s27, 128  ;;  %p535_p12 = scmp.lt.s32.totalorder %s17_s27, %s17_s27 }
  0x1b   :  { %p531_p11 = scmp.ne.s32.totalorder %s17_s27, %s530_s1  ;;  %p536_p13 = scmp.lt.s32.totalorder %s530_s1, %s530_s1 }
  0x1d   :  { %p537_p0 = por %p536_p13, %p535_p12 }
  0x1f   :  { %p538_p1 = pnand %p537_p0, %p531_p11 }
  0x21   :  { %541 = shalt.err (!%p538_p1)
}
  0x22   :  { %19 = dma.hbm_to_vmem [thread:$0]  %s688_s0, 128, %s17_s27, [#allocation3]  }
  0x23   :  { %s542_s14 = scalar_lea.hbm %s690_s2, 256 }
  0x24   :  { %p543_p2 = scmp.ne.s32.totalorder %s690_s2, %s542_s14  ;;  %p546_p3 = scmp.lt.u32.totalorder %s542_s14, %s690_s2 }
  0x26   :  { %p548_p4 = pnand %p546_p3, %p543_p2 }
  0x28   :  { %551 = shalt.err (!%p548_p4)
}
  0x29   :  { %s552_s19 = scalar_lea.vmem %s38_s29, 256  ;;  %p557_p6 = scmp.lt.s32.totalorder %s38_s29, %s38_s29 }
  0x2a   :  { %p553_p5 = scmp.ne.s32.totalorder %s38_s29, %s552_s19  ;;  %p558_p7 = scmp.lt.s32.totalorder %s552_s19, %s552_s19 }
  0x2c   :  { %p559_p8 = por %p558_p7, %p557_p6 }
  0x2e   :  { %p560_p9 = pnand %p559_p8, %p553_p5 }
  0x30   :  { %563 = shalt.err (!%p560_p9)
}
  0x31   :  { %43 = dma.hbm_to_vmem [thread:$0]  %s690_s2, 256, %s38_s29, [#allocation5], %s569_s22, %s569_s22, %s570_s23  }
  0x32   :  { %564 = dma.done.wait [#allocation3], 128  }
  0x33   :  { %565 = vsyncadd [#allocation3], 4294967168 }
  0x34   :  { %566 = dma.done.wait [#allocation5], 2688  }
  0x35   :  { %567 = vsyncadd [#allocation5], 4294964608  ;;  %v573_v0 = vmov 0.0|0.0   ;;  %vm574_vm0 = vmmov 0   ;;  %v575_v1 = vmov 0.0   ;;  %vm75_vm1 = vcmask 195584  }
  0x36   :  { %457 = vmatprep.subr.bf16.mxu0 %v573_v0  ;;  %419 = vmatprep.mubr.msk.f32.mxu0 %vm574_vm0, %v575_v1  ;;  %v56_v2 = vld [vmem:[#allocation4] sm:$0xff]  ;;  %v57_v3 = vld [vmem:[#allocation4 + $0x8] sm:$0xff]  ;;  %v53_v5 = vld [vmem:[#allocation2] sm:$0xff]  ;;  %v114_v28 = vlaneseq  ;;  %vm383_vm2 = vcmask 7168  }
  0x37   :  { %460 = vmatprep.subr.bf16.mxu1 %v573_v0  ;;  %454 = vmatprep.mubr.msk.f32.mxu1 %vm574_vm0, %v575_v1  ;;  %v458_v4 = vpack.c.bf16 %v57_v3, %v56_v2  ;;  %v76_v6 = vsel %vm75_vm1, %v53_v5, 0.0  ;;  %v83_v7 = vmul.f32 %v53_v5, %v53_v5  ;;  %v58_v9 = vld [vmem:[#allocation4 + $0x10] sm:$0xff]  ;;  %v642_v29 = vld [vmem:[#allocation6] sm:$0xff]  ;;  %v60_v48 = vld [vmem:[#allocation4 + $0x20] sm:$0xff] }
  0x38   :  { %v77_v8 = vrot.slane %v76_v6, 4  ;;  %v645_v32 = vshrl.u32 %v114_v28, 7  ;;  %v648_v34 = vsub.f32 1.0, %v642_v29  ;;  %v59_v47 = vld [vmem:[#allocation4 + $0x18] sm:$0xff]  ;;  %v61_v49 = vld [vmem:[#allocation4 + $0x28] sm:$0xff]  ;;  %v62_v51 = vld [vmem:[#allocation4 + $0x30] sm:$0xff] }
  0x39   :  { %459 = vmatpush3.bf16.msra.mxu0 %v458_v4  ;;  %v84_v10 = vsel %vm75_vm1, %v83_v7, 0.0  ;;  %v461_v50 = vpack.c.bf16 %v60_v48, %v59_v47  ;;  %v464_v52 = vpack.c.bf16 %v62_v51, %v61_v49  ;;  %v63_v53 = vld [vmem:[#allocation4 + $0x38] sm:$0xff]  ;;  %v64_v54 = vld [vmem:[#allocation4 + $0x40] sm:$0xff]  ;;  %v65_v56 = vld [vmem:[#allocation4 + $0x48] sm:$0xff] }
  0x3a   :  { %417 = vmatprep.subr.mxu0 %v575_v1  ;;  %v78_v11 = vadd.f32 %v77_v8, %v76_v6  ;;  %v85_v12 = vrot.slane %v84_v10, 4  ;;  %v652_v38 = vsub.s32 2, %v645_v32  ;;  %v467_v55 = vpack.c.bf16 %v64_v54, %v63_v53  ;;  %v66_v57 = vld [vmem:[#allocation4 + $0x50] sm:$0xff]  ;;  %v67_v59 = vld [vmem:[#allocation4 + $0x58] sm:$0xff]  ;;  %v68_v60 = vld [vmem:[#allocation4 + $0x60] sm:$0xff] }
  0x3b   :  { %462 = vmatpush3.bf16.msra.mxu1 %v461_v50  ;;  %v470_v58 = vpack.c.bf16 %v66_v57, %v65_v56  ;;  %v473_v61 = vpack.c.bf16 %v68_v60, %v67_v59  ;;  %v69_v62 = vld [vmem:[#allocation4 + $0x68] sm:$0xff]  ;;  %v70_v63 = vld [vmem:[#allocation4 + $0x70] sm:$0xff]  ;;  %v71_v2 = vld [vmem:[#allocation4 + $0x78] sm:$0xff]  ;;  %v126_v8 = vsub.s32 3, %v645_v32  ;;  %v253_v53 = vsub.s32 0, %v645_v32 }
  0x3c   :  { %v79_v13 = vrot.slane %v78_v11, 2  ;;  %v86_v14 = vadd.f32 %v85_v12, %v84_v10  ;;  %463 = vmatprep.subr.bf16.mxu1 %v573_v0  ;;  %v476_v1 = vpack.c.bf16 %v70_v63, %v69_v62  ;;  %v72_v3 = vld [vmem:[#allocation4 + $0x80] sm:$0xff]  ;;  %v74_v6 = vld [vmem:[#allocation4 + $0x90] sm:$0xff] }
  0x3d   :  { %418 = vmatpush3.msra.mxu0 %v58_v9  ;;  %v479_v4 = vpack.c.bf16 %v72_v3, %v71_v2  ;;  %v203_v9 = vsub.s32 7, %v645_v32  ;;  %v127_v10 = vrot.slane %v642_v29, %v126_v8  ;;  %v55_v54 = vld [vmem:[#allocation6 + $0x8] sm:$0x7] }
  0x3e   :  { %v80_v15 = vadd.f32 %v79_v13, %v78_v11  ;;  %v87_v16 = vrot.slane %v86_v14, 2 }
  0x3f   :  { %465 = vmatpush3.bf16.msra.mxu1 %v464_v52  ;;  %v204_v11 = vrot.slane %v642_v29, %v203_v9 }
  0x40   :  { %v81_v17 = vrot.slane %v80_v15, 1  ;;  %v88_v18 = vadd.f32 %v87_v16, %v86_v14  ;;  %466 = vmatprep.subr.bf16.mxu1 %v573_v0 }
  0x42   :  { %v82_v19 = vadd.f32 %v81_v17, %v80_v15  ;;  %v89_v20 = vrot.slane %v88_v18, 1 }
  0x43   :  { %468 = vmatpush3.bf16.msra.mxu1 %v467_v55  ;;  %v254_v55 = vrot.slane %v55_v54, %v253_v53 }
  0x44   :  { %v90_v21 = vadd.f32 %v89_v20, %v88_v18  ;;  %v91_v22 = vmul.f32 0.125, %v82_v19  ;;  %469 = vmatprep.subr.bf16.mxu1 %v573_v0 }
  0x46   :  { %v92_v23 = vmul.f32 0.125, %v90_v21  ;;  %v93_v24 = vmul.f32 %v91_v22, %v91_v22 }
  0x47   :  { %471 = vmatpush3.bf16.msra.mxu1 %v470_v58 }
  0x48   :  { %v94_v25 = vsub.f32 %v92_v23, %v93_v24  ;;  %472 = vmatprep.subr.bf16.mxu1 %v573_v0 }
  0x4a   :  { %v95_v26 = vmax.f32 %v94_v25, 0.0 }
  0x4b   :  { %474 = vmatpush3.bf16.msra.mxu1 %v473_v61 }
  0x4c   :  { %v96_v27 = vadd.f32 1e-05, %v95_v26  ;;  %475 = vmatprep.subr.bf16.mxu1 %v573_v0 }
  0x4e   :  { %492 = vrsqrt.f32 %v96_v27 }
  0x4f   :  { %477 = vmatpush3.bf16.msra.mxu1 %v476_v1 }
  0x50   :  { %478 = vmatprep.subr.bf16.mxu1 %v573_v0 }
  0x53   :  { %480 = vmatpush3.bf16.msra.mxu1 %v479_v4 }
  0x54   :  { %481 = vmatprep.subr.bf16.mxu1 %v573_v0 }
  0x58   :  { %v493_v30 = vpop.eup %492 }
  0x59   :  { %v98_v31 = vmul.f32 %v493_v30, %v642_v29 }
  0x5b   :  { %v100_v33 = vrot.slane %v98_v31, 6  ;;  %v105_v35 = vmul.f32 %v98_v31, %v91_v22 }
  0x5d   :  { %v102_v36 = vmul.f32 %v100_v33, %v642_v29  ;;  %v107_v37 = vrot.slane %v105_v35, 7 }
  0x5f   :  { %v104_v39 = vadd.f32 %v648_v34, %v102_v36  ;;  %v109_v40 = vsub.f32 %v642_v29, %v107_v37 }
  0x61   :  { %v111_v41 = vrot.slane %v109_v40, 7  ;;  %v117_v42 = vrot.slane %v104_v39, %v652_v38 }
  0x63   :  { %v113_v43 = vmul.f32 %v111_v41, %v642_v29  ;;  %v118_v44 = vmul.f32 %v117_v42, %v53_v5  ;;  %v73_v5 = vld [vmem:[#allocation4 + $0x88] sm:$0xff] }
  0x64   :  { %v482_v7 = vpack.c.bf16 %v74_v6, %v73_v5 }
  0x65   :  { %v122_v45 = vrot.slane %v113_v43, %v652_v38 }
  0x66   :  { %483 = vmatpush3.bf16.msra.mxu1 %v482_v7 }
  0x67   :  { %v123_v46 = vadd.f32 %v122_v45, %v118_v44  ;;  %v243_v44 = vsub.s32 6, %v645_v32 }
  0x69   :  { %420 = vmatmul.mubr.msk.f32.vlgmr.msra.gmra.mrb[0].mxu0 %vm75_vm1, %v123_v46 }
 0x13c   :  { %v197_v12 = vpop.f32.mrb[0].mxu0 }
 0x13d   :  { %v198_v13 = vadd.f32 %v197_v12, %v127_v10  ;;  %v421_v14 = vpop.f32.mrb[1].mxu0 }
 0x13f   :  { %v205_v15 = vmax.f32 %v198_v13, %v204_v11 }
 0x141   :  { %v206_v16 = vrot.slane %v205_v15, 4  ;;  %v212_v17 = vmul.f32 %v205_v15, %v205_v15 }
 0x143   :  { %v207_v18 = vadd.f32 %v206_v16, %v205_v15  ;;  %v213_v19 = vrot.slane %v212_v17, 4 }
 0x145   :  { %v208_v20 = vrot.slane %v207_v18, 2  ;;  %v214_v21 = vadd.f32 %v213_v19, %v212_v17 }
 0x147   :  { %v209_v0 = vadd.f32 %v208_v20, %v207_v18  ;;  %v215_v22 = vrot.slane %v214_v21, 2 }
 0x149   :  { %v210_v23 = vrot.slane %v209_v0, 1  ;;  %v216_v24 = vadd.f32 %v215_v22, %v214_v21 }
 0x14b   :  { %v211_v25 = vadd.f32 %v210_v23, %v209_v0  ;;  %v217_v26 = vrot.slane %v216_v24, 1 }
 0x14d   :  { %v218_v27 = vadd.f32 %v217_v26, %v216_v24  ;;  %v219_v28 = vmul.f32 0.125, %v211_v25  ;;  %v373_v25 = vsub.s32 1, %v645_v32 }
 0x14f   :  { %v220_v30 = vmul.f32 0.125, %v218_v27  ;;  %v221_v31 = vmul.f32 %v219_v28, %v219_v28 }
 0x151   :  { %v222_v33 = vsub.f32 %v220_v30, %v221_v31  ;;  %v374_v30 = vrot.slane %v55_v54, %v373_v25 }
 0x153   :  { %v223_v35 = vmax.f32 %v222_v33, 0.0 }
 0x155   :  { %v224_v36 = vadd.f32 1e-05, %v223_v35  ;;  %v381_v35 = vrot.slane %v55_v54, %v652_v38 }
 0x157   :  { %494 = vrsqrt.f32 %v224_v36 }
 0x161   :  { %v495_v37 = vpop.eup %494 }
 0x162   :  { %v226_v39 = vmul.f32 %v495_v37, %v642_v29 }
 0x164   :  { %v228_v40 = vrot.slane %v226_v39, 6  ;;  %v232_v41 = vmul.f32 %v226_v39, %v219_v28 }
 0x166   :  { %v230_v42 = vmul.f32 %v228_v40, %v642_v29  ;;  %v234_v43 = vrot.slane %v232_v41, 7 }
 0x168   :  { %v231_v45 = vadd.f32 %v230_v42, %v648_v34  ;;  %v236_v46 = vsub.f32 %v642_v29, %v234_v43 }
 0x16a   :  { %v238_v47 = vrot.slane %v236_v46, 7  ;;  %v244_v48 = vrot.slane %v231_v45, %v243_v44 }
 0x16c   :  { %v240_v49 = vmul.f32 %v238_v47, %v642_v29  ;;  %v245_v50 = vmul.f32 %v244_v48, %v205_v15 }
 0x16e   :  { %v249_v51 = vrot.slane %v240_v49, %v243_v44 }
 0x170   :  { %v250_v52 = vadd.f32 %v249_v51, %v245_v50 }
 0x172   :  { %455 = vmatmul.mubr.f32.vlgmr.msra.gmra.mrb[0].mxu1 %v250_v52 }
 0x245   :  { %v321_v56 = vpop.f32.mrb[0].mxu1 }
 0x246   :  { %v322_v57 = vadd.f32 %v321_v56, %v254_v55  ;;  %v456_v58 = vpop.f32.mrb[1].mxu1 }
 0x248   :  { %v325_v59 = vrot.slane %v322_v57, 4  ;;  %v331_v60 = vmul.f32 %v322_v57, %v322_v57 }
 0x24a   :  { %v326_v61 = vadd.f32 %v325_v59, %v322_v57  ;;  %v332_v62 = vrot.slane %v331_v60, 4 }
 0x24c   :  { %v327_v63 = vrot.slane %v326_v61, 2  ;;  %v333_v1 = vadd.f32 %v332_v62, %v331_v60 }
 0x24e   :  { %v328_v2 = vadd.f32 %v327_v63, %v326_v61  ;;  %v334_v3 = vrot.slane %v333_v1, 2 }
 0x250   :  { %v329_v4 = vrot.slane %v328_v2, 1  ;;  %v335_v5 = vadd.f32 %v334_v3, %v333_v1 }
 0x252   :  { %v330_v6 = vadd.f32 %v329_v4, %v328_v2  ;;  %v336_v7 = vrot.slane %v335_v5, 1 }
 0x254   :  { %v337_v8 = vadd.f32 %v336_v7, %v335_v5  ;;  %v338_v9 = vmul.f32 0.125, %v330_v6 }
 0x256   :  { %v339_v10 = vmul.f32 0.125, %v337_v8  ;;  %v340_v11 = vmul.f32 %v338_v9, %v338_v9 }
 0x258   :  { %v341_v12 = vsub.f32 %v339_v10, %v340_v11 }
 0x25a   :  { %v342_v13 = vmax.f32 %v341_v12, 0.0 }
 0x25c   :  { %v343_v14 = vadd.f32 1e-05, %v342_v13 }
 0x25e   :  { %496 = vrsqrt.f32 %v343_v14 }
 0x268   :  { %v497_v15 = vpop.eup %496 }
 0x269   :  { %v345_v16 = vmul.f32 %v497_v15, %v642_v29 }
 0x26b   :  { %v347_v17 = vrot.slane %v345_v16, 6  ;;  %v351_v18 = vmul.f32 %v345_v16, %v338_v9 }
 0x26d   :  { %v349_v19 = vmul.f32 %v347_v17, %v642_v29  ;;  %v353_v20 = vrot.slane %v351_v18, 7 }
 0x26f   :  { %v350_v21 = vadd.f32 %v349_v19, %v648_v34  ;;  %v355_v0 = vsub.f32 %v642_v29, %v353_v20 }
 0x271   :  { %v357_v22 = vrot.slane %v355_v0, 7  ;;  %v363_v23 = vrot.slane %v350_v21, %v243_v44 }
 0x273   :  { %v359_v24 = vmul.f32 %v357_v22, %v642_v29  ;;  %v364_v26 = vmul.f32 %v363_v23, %v322_v57 }
 0x275   :  { %v368_v27 = vrot.slane %v359_v24, %v243_v44 }
 0x277   :  { %v369_v28 = vadd.f32 %v368_v27, %v364_v26 }
 0x279   :  { %v370_v31 = vmax.f32 %v369_v28, 0.0 }
 0x27b   :  { %v375_v33 = vmul.f32 %v374_v30, %v370_v31 }
 0x27d   :  { %376 = vadd.xlane.f32.xlu0 %v375_v33 }
 0x30a   :  { %v377_v36 = vpop.xlane.xlu0 %376 }
 0x30b   :  { %v382_v34 = vadd.f32 %v381_v35, %v377_v36 }
 0x30d   :  { %384 = vst.msk [vmem:[%s691_s3] sm:$0xff] %vm383_vm2, %v382_v34 }
 0x30e   :  { %389 = vsyncpa [#allocation3], 1 }
 0x30f   :  { %390 = vsyncpa [#allocation5], 1 }

</bundles_post_ra>
